<compile_context>
chip_gen: v5e
topology: v5e:2x2
jax: 0.10.0
libtpu: 0.0.40
codegen_flags: <defaults>
</compile_context>

<pallas_src>
import functools
import math

import jax
import jax.numpy as jnp
from jax import lax
from jax.experimental import pallas as pl
from jax.experimental.pallas import tpu as pltpu

_LANE = 128


# ----------------------------- kernels -------------------------------------
def _expand_groups(v, g, s, shape):
    """v: (r_tile, g) per-(row, channel-group) scalars -> broadcast to `shape`.

    Lane j of a row belongs to channel-group j // s.  g == 1 degenerates to a
    plain (r_tile, 1) broadcast.  g is small (<= 8), so the select chain is a
    handful of VPU ops on an otherwise DMA-bound kernel.
    """
    if g == 1:
        return v
    grp = lax.broadcasted_iota(jnp.int32, shape, 1) // s
    out = jnp.broadcast_to(v[:, 0:1], shape)
    for c in range(1, g):
        out = jnp.where(grp >= c, v[:, c:c + 1], out)
    return out


def _affine_kernel(x_ref, gb_ref, o_ref, *, g, s):
    # (1 + gamma) * x + beta   --  pure VPU broadcast FMA, f32 accumulate.
    x = x_ref[...].astype(jnp.float32)
    gb = gb_ref[...].astype(jnp.float32)           # (r_tile, 2g) [gamma | beta]
    gamma = _expand_groups(gb[:, :g], g, s, x.shape)
    beta = _expand_groups(gb[:, g:], g, s, x.shape)
    o_ref[...] = ((1.0 + gamma) * x + beta).astype(o_ref.dtype)


def _add_kernel(x_ref, sh_ref, o_ref, *, g, s):
    # x + shift  -- pure VPU broadcast add, f32 accumulate.
    x = x_ref[...].astype(jnp.float32)
    shift = _expand_groups(sh_ref[...].astype(jnp.float32), g, s, x.shape)
    o_ref[...] = (x + shift).astype(o_ref.dtype)


# ----------------------------- tiling helpers -------------------------------
def _sublane_align(dtype):
    # 8 for f32, 16 for bf16, 32 for int8/fp8 (sub-32-bit packs along sublanes)
    return max(8, 32 // jnp.dtype(dtype).itemsize)


def _round_down(x, m):
    return (x // m) * m


def _round_up(x, m):
    return ((x + m - 1) // m) * m


def _vmem_capacity_bytes():
    try:
        cap = getattr(pltpu.get_tpu_info(), "vmem_capacity_bytes", None)
        if cap:
            return int(cap)
    except Exception:
        pass
    return 64 * 1024 * 1024        # conservative fallback: v7x per-core VMEM


# ----------------------------- wrapper --------------------------------------
def feature_wise_affine(x, noise_embed, weight, bias, use_affine_level=False,
                        *, small_fallback_bytes=2 * 1024 * 1024):
    """x: (B, C, H, W); noise_embed: (B, Cin);
    weight: (Cin, C*(1+use_affine_level)); bias: (C*(1+use_affine_level),)."""
    B, C, H, W = x.shape
    S = H * W
    itemsize = jnp.dtype(x.dtype).itemsize

    # Tiny Linear hoisted off the hot per-tile path (MXU share ~0%).
    y = (noise_embed.astype(jnp.float32) @ weight.astype(jnp.float32)
         + bias.astype(jnp.float32))                      # (B, C) or (B, 2C)

    # Small tensors: a fused XLA broadcast beats pallas_call launch overhead.
    if B * C * S * itemsize < small_fallback_bytes:
        y4 = y.reshape(B, -1, 1, 1)
        xf = x.astype(jnp.float32)
        if use_affine_level:
            g4, b4 = jnp.split(y4, 2, axis=1)
            return ((1.0 + g4) * xf + b4).astype(x.dtype)
        return (xf + y4).astype(x.dtype)

    # ---- choose a lane-dense 2-D view of x ---------------------------------
    # g channels are folded into the lane axis when H*W < 128, so the last
    # dim becomes a multiple of 128 (unmasked vector stores).
    g = 1
    if S < _LANE:
        cand = _LANE // math.gcd(S, _LANE)
        if cand <= 8 and (B * C) % cand == 0:
            g = cand
    R, L = (B * C) // g, g * S
    x2 = x.reshape(R, L)

    # ---- tile sizes from a generation-aware VMEM budget ---------------------
    vmem_limit = min(_vmem_capacity_bytes() // 2, 64 * 1024 * 1024)
    tile_bytes = max(vmem_limit // 8, 512 * 1024)   # ~4 MiB v7x, ~8 MiB v5e/v6e
    r_align = _sublane_align(x.dtype)

    if g > 1 or L < _LANE:
        s_tile = L                                   # full lane extent
    else:
        s_tile = min(max(_round_down(L, _LANE), _LANE), 2048)
    r_tile = (tile_bytes // itemsize) // s_tile
    if r_tile >= R:
        r_tile = R                                   # full extent is legal
    else:
        r_tile = max(_round_down(r_tile, r_align), r_align)
    # Guarantee >= 2 blocks on the (parallel) row axis when a single tile
    # would cover everything, so both v7x TensorCores get work.
    if pl.cdiv(R, r_tile) * pl.cdiv(L, s_tile) == 1 and R >= 2 * r_align:
        r_tile = _round_up(pl.cdiv(R, 2), r_align)
    grid = (pl.cdiv(R, r_tile), pl.cdiv(L, s_tile))

    x_spec = pl.BlockSpec((r_tile, s_tile), lambda r, s: (r, s))
    out_spec = pl.BlockSpec((r_tile, s_tile), lambda r, s: (r, s))
    compiler_params = pltpu.CompilerParams(
        dimension_semantics=("parallel", "parallel"),
        vmem_limit_bytes=vmem_limit,
    )

    if use_affine_level:
        gamma = y[:, :C].reshape(R, g)
        beta = y[:, C:].reshape(R, g)
        gb = jnp.concatenate([gamma, beta], axis=1)       # (R, 2g) one DMA
        vec_spec = pl.BlockSpec((r_tile, 2 * g), lambda r, s: (r, 0))
        kernel = functools.partial(_affine_kernel, g=g, s=S)
        operands = (x2, gb)
        flops, vec_bytes = 3 * R * L, 8 * R * g
    else:
        shift = y.reshape(R, g)
        vec_spec = pl.BlockSpec((r_tile, g), lambda r, s: (r, 0))
        kernel = functools.partial(_add_kernel, g=g, s=S)
        operands = (x2, shift)
        flops, vec_bytes = R * L, 4 * R * g

    out = pl.pallas_call(
        kernel,
        out_shape=jax.ShapeDtypeStruct((R, L), x.dtype),
        grid=grid,
        in_specs=[x_spec, vec_spec],
        out_specs=out_spec,
        input_output_aliases={0: 0},          # write in place over x's buffer
        compiler_params=compiler_params,
        cost_estimate=pl.CostEstimate(
            flops=flops, transcendentals=0,
            bytes_accessed=2 * R * L * itemsize + vec_bytes),
    )(*operands)
    return out.reshape(B, C, H, W)


# ----------------------------- reference & demo -----------------------------
def _reference(x, noise_embed, weight, bias, use_affine_level):
    B = x.shape[0]
    y = (noise_embed.astype(jnp.float32) @ weight.astype(jnp.float32)
         + bias.astype(jnp.float32)).reshape(B, -1, 1, 1)
    xf = x.astype(jnp.float32)
    if use_affine_level:
        gma, bta = jnp.split(y, 2, axis=1)
        return (1.0 + gma) * xf + bta
    return xf + y


if __name__ == "__main__":
    B, IN_CH, OUT_CH, H, W = 2, 32, 4, 16, 16
    key = jax.random.PRNGKey(0)
    keys = jax.random.split(key, 8)
    bound = 1.0 / (IN_CH ** 0.5)   # nn.Linear-style U(-1/sqrt(in), 1/sqrt(in))

    x = jax.random.normal(keys[0], (B, OUT_CH, H, W), dtype=jnp.float32)
    noise = jax.random.normal(keys[1], (B, IN_CH), dtype=jnp.float32)
    w_add = jax.random.uniform(keys[2], (IN_CH, OUT_CH), jnp.float32, -bound, bound)
    b_add = jax.random.uniform(keys[3], (OUT_CH,), jnp.float32, -bound, bound)
    w_aff = jax.random.uniform(keys[4], (IN_CH, 2 * OUT_CH), jnp.float32, -bound, bound)
    b_aff = jax.random.uniform(keys[5], (2 * OUT_CH,), jnp.float32, -bound, bound)

    # References computed first (defensive w.r.t. input/output aliasing).
    ref_add = _reference(x, noise, w_add, b_add, False)
    ref_aff = _reference(x, noise, w_aff, b_aff, True)

    # Force the Pallas path even at demo size (small_fallback_bytes=0).
    out_add = feature_wise_affine(x, noise, w_add, b_add, False,
                                  small_fallback_bytes=0)
    out_aff = feature_wise_affine(x, noise, w_aff, b_aff, True,
                                  small_fallback_bytes=0)
    jax.block_until_ready((out_add, out_aff))
    assert jnp.allclose(out_add, ref_add, atol=1e-5, rtol=1e-5)
    assert jnp.allclose(out_aff, ref_aff, atol=1e-5, rtol=1e-5)

    # Default behavior: tiny tensors take the fused-XLA fallback path.
    out_fb = feature_wise_affine(x, noise, w_aff, b_aff, True)
    jax.block_until_ready(out_fb)
    assert jnp.allclose(out_fb, ref_aff, atol=1e-5, rtol=1e-5)

    # bf16 activations: exercises dtype-aware sublane alignment (16) and the
    # >=2-row-block megacore split.
    xb = jax.random.normal(keys[6], (2, 64, 16, 16), dtype=jnp.bfloat16)
    w_b = jax.random.uniform(keys[2], (IN_CH, 2 * 64), jnp.float32, -bound, bound)
    b_b = jax.random.uniform(keys[3], (2 * 64,), jnp.float32, -bound, bound)
    ref_b = _reference(xb, noise, w_b, b_b, True)
    out_b = feature_wise_affine(xb, noise, w_b, b_b, True, small_fallback_bytes=0)
    jax.block_until_ready(out_b)
    assert jnp.allclose(out_b.astype(jnp.float32), ref_b, atol=5e-2, rtol=5e-2)

    # Small spatial map (8x8 -> S=64 < 128): exercises the lane-dense channel
    # fold (g=2) for both the affine and the plain-shift branch.
    xs = jax.random.normal(keys[7], (2, 8, 8, 8), dtype=jnp.float32)
    w_s2 = jax.random.uniform(keys[4], (IN_CH, 2 * 8), jnp.float32, -bound, bound)
    b_s2 = jax.random.uniform(keys[5], (2 * 8,), jnp.float32, -bound, bound)
    w_s1 = jax.random.uniform(keys[0], (IN_CH, 8), jnp.float32, -bound, bound)
    b_s1 = jax.random.uniform(keys[1], (8,), jnp.float32, -bound, bound)
    ref_s2 = _reference(xs, noise, w_s2, b_s2, True)
    ref_s1 = _reference(xs, noise, w_s1, b_s1, False)
    out_s2 = feature_wise_affine(xs, noise, w_s2, b_s2, True, small_fallback_bytes=0)
    out_s1 = feature_wise_affine(xs, noise, w_s1, b_s1, False, small_fallback_bytes=0)
    jax.block_until_ready((out_s2, out_s1))
    assert jnp.allclose(out_s2, ref_s2, atol=1e-5, rtol=1e-5)
    assert jnp.allclose(out_s1, ref_s1, atol=1e-5, rtol=1e-5)

    print("KERNEL_OK")
</pallas_src>

<mosaic_0001>
module attributes {stable_mosaic.version = 11 : i64} {
  func.func @_add_kernel(%arg0: i32, %arg1: i32, %arg2: memref<8x256xf32, #tpu.memory_space<vmem>>, %arg3: memref<8x1xf32, #tpu.memory_space<vmem>>, %arg4: memref<8x256xf32, #tpu.memory_space<vmem>>) attributes {dimension_semantics = [#tpu.dimension_semantics<parallel>, #tpu.dimension_semantics<parallel>], iteration_bounds = array<i64: 1, 1>, scalar_prefetch = 0 : i64, scratch_operands = 0 : i64, tpu.core_type = #tpu.core_type<tc>, window_params = [{transform_indices = @transform_0, window_bounds = array<i64: 8, 256>}, {transform_indices = @transform_1, window_bounds = array<i64: 8, 1>}, {transform_indices = @transform_2, window_bounds = array<i64: 8, 256>}]} {
    %c0 = arith.constant 0 : index
    %c0_0 = arith.constant 0 : index
    %0 = vector.load %arg2[%c0, %c0_0] : memref<8x256xf32, #tpu.memory_space<vmem>>, vector<8x256xf32>
    %c0_1 = arith.constant 0 : index
    %c0_2 = arith.constant 0 : index
    %1 = vector.load %arg3[%c0_1, %c0_2] : memref<8x1xf32, #tpu.memory_space<vmem>>, vector<8x1xf32>
    %2 = vector.broadcast %1 : vector<8x1xf32> to vector<8x256xf32>
    %3 = arith.addf %0, %2 : vector<8x256xf32>
    %c0_3 = arith.constant 0 : index
    %c0_4 = arith.constant 0 : index
    %4 = vector.load %arg4[%c0_3, %c0_4] : memref<8x256xf32, #tpu.memory_space<vmem>>, vector<8x256xf32>
    tpu.vector_store %arg4[%c0_3, %c0_4], %3 {strides = array<i32>} : memref<8x256xf32, #tpu.memory_space<vmem>>, vector<8x256xf32>,
    return
  }
  func.func @transform_0(%arg0: i32, %arg1: i32) -> (i32, i32) {
    %c0_i32 = arith.constant 0 : i32
    return %arg0, %arg1 : i32, i32
  }
  func.func @transform_1(%arg0: i32, %arg1: i32) -> (i32, i32) {
    %c0_i32 = arith.constant 0 : i32
    %c0_i32_0 = arith.constant 0 : i32
    return %arg0, %c0_i32 : i32, i32
  }
  func.func @transform_2(%arg0: i32, %arg1: i32) -> (i32, i32) {
    %c0_i32 = arith.constant 0 : i32
    return %arg0, %arg1 : i32, i32
  }
}

</mosaic_0001>

<bundles_post_ra>
// kernel: tpu_custom_call.1
= control target key start
LH: loop header
LB: loop body
LE: loop exit
PB: predicated region body
PF: predicated region fallthrough
CT: control target
= control target key end

     0   :  { %7 = vsyncpa [#allocation3], 0  ;;  %s138_s0 = inlined_call_operand.hbm [shape: f32[8,256], index: 0, kind: input, shape index: {}, may-alias: {0,2}]   ;;  %s139_s1 = inlined_call_operand.vmem [shape: f32[8,1], index: 1, kind: input, shape index: {}]   ;;  %s140_s2 = inlined_call_operand.hbm [shape: f32[8,256], index: 2, kind: output, shape index: {}, may-alias: {0,2}]  }
   0x1   :  { %8 = vsyncpa [#allocation4], 0  ;;  %s14_s11 = sshll.u32 %s138_s0, 4  ;;  %s111_s12 = smov [#allocation2]   ;;  %s15_s11 = int_to_ptr.hbm [resolvable:$true] %s14_s11 }
   0x2   :  { %s16_s13 = sshll.u32 %s111_s12, 4  ;;  %s17_s13 = int_to_ptr.vmem [resolvable:$true] %s16_s13 }
   0x3   :  { %19 = dma.hbm_to_vmem [thread:$0]  %s15_s11, 256, %s17_s13, [#allocation3]  }
   0x4   :  { %107 = dma.done.wait [#allocation3], 256  }
   0x5   :  { %108 = vsyncadd [#allocation3], 4294967040  ;;  %v112_v0 = vmov 0   ;;  %v28_v1 = vld [vmem:[%s139_s1] sm:$0xff]  ;;  %v27_v3 = vld [vmem:[#allocation2 + $0x8] sm:$0xff]  ;;  %s113_s16 = smov [#allocation5]  }
   0x6   :  { %58 = vset.pattern.permute.xlu0 %v112_v0  ;;  %v26_v2 = vld [vmem:[#allocation2] sm:$0xff]  ;;  %s43_s17 = sshll.u32 %s113_s16, 4  ;;  %s45_s19 = sshll.u32 %s140_s2, 4  ;;  %s44_s17 = int_to_ptr.vmem [resolvable:$true] %s43_s17  ;;  %s46_s19 = int_to_ptr.hbm [resolvable:$true] %s45_s19 }
   0x7   :  { %31 = vperm.xlu0 %58, %v28_v1  }
  0x79   :  { %v32_v4 = vpop.permute.xlu0 %31 }
  0x7a   :  { %v34_v5 = vadd.f32 %v32_v4, %v26_v2  ;;  %v35_v6 = vadd.f32 %v32_v4, %v27_v3 }
  0x7c   :  { %36 = vst [vmem:[#allocation5] sm:$0xff] %v34_v5 }
  0x7d   :  { %37 = vst [vmem:[#allocation5 + $0x8] sm:$0xff] %v35_v6 }
  0x7e   :  { %48 = dma.vmem_to_hbm [thread:$0]  %s44_s17, 256, %s46_s19, [#allocation4]  }
  0x7f   :  { %109 = dma.done.wait [#allocation4], 256  }
  0x80   :  { %110 = vsyncadd [#allocation4], 4294967040 }
  0x81   :  { %53 = vsyncpa [#allocation3], 1 }
  0x82   :  { %54 = vsyncpa [#allocation4], 1 }

</bundles_post_ra>
